<compile_context>
chip_gen: v7x
topology: tpu7x:2x2x1
jax: 0.10.0
libtpu: 0.0.40
codegen_flags: <defaults>
</compile_context>

<pallas_src>
import jax
import jax.numpy as jnp
import numpy as np
from jax import lax
from jax.experimental import pallas as pl
from jax.experimental.pallas import tpu as pltpu

_LANE = 128
_SUBLANE = 8


def _round_up(n, m):
    return ((n + m - 1) // m) * m


def _proto_dist_kernel(x_ref, p_ref, pp_ref, o_ref):
    # x_ref : (TB,    C_pad)  one batch tile (pipelined)
    # p_ref : (P_pad, C_pad)  resident prototypes
    # pp_ref: (1,     P_pad)  precomputed ||proto||^2 (constant across steps)
    # o_ref : (TB,    P_pad)
    x = x_ref[...]
    p = p_ref[...]

    # ||x||^2 per row -> (TB, 1)  (VPU reduce; tiny vs. the MXU cross term)
    xx = jnp.sum(x * x, axis=-1, keepdims=True)

    # Cross term on the MXU; contract dim 1 of x with dim 1 of p -> (TB, P_pad).
    cross = lax.dot_general(
        x, p,
        dimension_numbers=(((1,), (1,)), ((), ())),
        preferred_element_type=jnp.float32,
    )

    o_ref[...] = (xx + pp_ref[...] - 2.0 * cross).astype(o_ref.dtype)


def prototype_layer(x, prototypes, *, block_b=512):
    """Pallas implementation of PrototypeLayer.forward (squared L2 distances)."""
    B, C = x.shape
    P, C2 = prototypes.shape
    assert C == C2, "feature dims must match"

    # Lane-dense padding: full vregs on the K (C) and N (P) axes.
    C_pad = _round_up(max(C, _LANE), _LANE)
    P_pad = _round_up(max(P, _LANE), _LANE)

    # Batch tile: multiple of 8 sublanes, capped so double-buffered x/out tiles
    # + resident prototypes stay well under the 32 MiB scoped VMEM of v7x.
    TB = min(block_b, _round_up(B, _SUBLANE))
    B_pad = _round_up(B, TB)

    xf = x.astype(jnp.float32)
    pf = prototypes.astype(jnp.float32)

    # Zero padding is semantics-preserving: padded C contributes 0 to norms and
    # dot products; padded P columns / padded B rows are sliced off below.
    x_p = jnp.zeros((B_pad, C_pad), jnp.float32).at[:B, :C].set(xf)
    p_p = jnp.zeros((P_pad, C_pad), jnp.float32).at[:P, :C].set(pf)

    # ||proto||^2 precomputed once in the wrapper (constant layer parameter):
    # no per-step VPU reduction or (P,1)->(1,P) transpose inside the kernel.
    pp = jnp.sum(p_p * p_p, axis=-1, keepdims=True).T  # (1, P_pad)

    grid = (B_pad // TB,)

    cost = pl.CostEstimate(
        flops=2 * B_pad * P_pad * C_pad + 2 * B_pad * C_pad + 3 * B_pad * P_pad,
        transcendentals=0,
        bytes_accessed=4 * (B_pad * C_pad + P_pad * C_pad + P_pad + B_pad * P_pad),
    )

    out_padded = pl.pallas_call(
        _proto_dist_kernel,
        out_shape=jax.ShapeDtypeStruct((B_pad, P_pad), jnp.float32),
        grid=grid,
        in_specs=[
            pl.BlockSpec((TB, C_pad), lambda i: (i, 0)),      # x tile (pipelined)
            pl.BlockSpec((P_pad, C_pad), lambda i: (0, 0)),   # prototypes (resident)
            pl.BlockSpec((1, P_pad), lambda i: (0, 0)),       # ||proto||^2 bias row
        ],
        out_specs=pl.BlockSpec((TB, P_pad), lambda i: (i, 0)),
        compiler_params=pltpu.CompilerParams(
            dimension_semantics=("parallel",),   # shard B tiles across TCs
            vmem_limit_bytes=32 * 1024 * 1024,   # explicit, v7x-safe budget
        ),
        cost_estimate=cost,
    )(x_p, p_p, pp)

    return out_padded[:B, :P]


def _reference(x, prototypes):
    xx = jnp.sum(x * x, axis=-1, keepdims=True)            # (B, 1)
    pp = jnp.sum(prototypes * prototypes, axis=-1)[None]   # (1, P)
    return xx + pp - 2.0 * x @ prototypes.T


if __name__ == "__main__":
    key = jax.random.PRNGKey(0)
    k_x, k_p = jax.random.split(key)

    in_channels = 10
    n_prototypes = 15
    batch = 8

    # Matches torch.rand(n_prototypes, in_channels) parameter init.
    prototypes = jax.random.uniform(
        k_p, (n_prototypes, in_channels), dtype=jnp.float32
    )
    # Input consistent with forward(): (batch, in_channels)
    x = jax.random.normal(k_x, (batch, in_channels), dtype=jnp.float32)

    out = prototype_layer(x, prototypes)
    out = jax.block_until_ready(out)

    ref = _reference(x, prototypes)
    np.testing.assert_allclose(np.asarray(out), np.asarray(ref), rtol=1e-5, atol=1e-5)

    # TODO(synk): if downstream code takes sqrt of these distances, clamp at 0
    # (cancellation can produce tiny negatives; same behavior as the PyTorch ref).
    print("KERNEL_OK")
</pallas_src>

<mosaic_0001>
module attributes {stable_mosaic.version = 11 : i64} {
  func.func @_proto_dist_kernel(%arg0: i32, %arg1: memref<8x128xf32, #tpu.memory_space<vmem>>, %arg2: memref<128x128xf32, #tpu.memory_space<vmem>>, %arg3: memref<1x128xf32, #tpu.memory_space<vmem>>, %arg4: memref<8x128xf32, #tpu.memory_space<vmem>>) attributes {dimension_semantics = [#tpu.dimension_semantics<parallel>], iteration_bounds = array<i64: 1>, scalar_prefetch = 0 : i64, scratch_operands = 0 : i64, tpu.core_type = #tpu.core_type<tc>, window_params = [{transform_indices = @transform_0, window_bounds = array<i64: 8, 128>}, {pipeline_mode = #tpu.pipeline_mode<synchronous>, transform_indices = @transform_1, window_bounds = array<i64: 128, 128>}, {pipeline_mode = #tpu.pipeline_mode<synchronous>, transform_indices = @transform_2, window_bounds = array<i64: 1, 128>}, {transform_indices = @transform_3, window_bounds = array<i64: 8, 128>}]} {
    %c0 = arith.constant 0 : index
    %c0_0 = arith.constant 0 : index
    %0 = vector.load %arg1[%c0, %c0_0] : memref<8x128xf32, #tpu.memory_space<vmem>>, vector<8x128xf32>
    %c0_1 = arith.constant 0 : index
    %c0_2 = arith.constant 0 : index
    %1 = vector.load %arg2[%c0_1, %c0_2] : memref<128x128xf32, #tpu.memory_space<vmem>>, vector<128x128xf32>
    %2 = arith.mulf %0, %0 : vector<8x128xf32>
    %cst = arith.constant dense<0.000000e+00> : vector<8xf32>
    %3 = vector.multi_reduction <add>, %2, %cst [1] : vector<8x128xf32> to vector<8xf32>
    %4 = vector.shape_cast %3 : vector<8xf32> to vector<8x1xf32>
    %cst_3 = arith.constant dense<0.000000e+00> : vector<8x128xf32>
    %5 = tpu.matmul %0, %1, %cst_3 {dimension_numbers = #tpu.dot_dimension_numbers<[1], [1], [0], [0], [0, 0, 1, 0], [], []>} : vector<8x128xf32>, vector<128x128xf32>, vector<8x128xf32> -> vector<8x128xf32>
    %c0_4 = arith.constant 0 : index
    %c0_5 = arith.constant 0 : index
    %6 = vector.load %arg3[%c0_4, %c0_5] : memref<1x128xf32, #tpu.memory_space<vmem>>, vector<1x128xf32>
    %7 = vector.broadcast %4 : vector<8x1xf32> to vector<8x128xf32>
    %8 = vector.broadcast %6 : vector<1x128xf32> to vector<8x128xf32>
    %9 = arith.addf %7, %8 : vector<8x128xf32>
    %cst_6 = arith.constant 2.000000e+00 : f32
    %10 = vector.broadcast %cst_6 : f32 to vector<8x128xf32>
    %11 = arith.mulf %10, %5 : vector<8x128xf32>
    %12 = arith.subf %9, %11 : vector<8x128xf32>
    %c0_7 = arith.constant 0 : index
    %c0_8 = arith.constant 0 : index
    %13 = vector.load %arg4[%c0_7, %c0_8] : memref<8x128xf32, #tpu.memory_space<vmem>>, vector<8x128xf32>
    tpu.vector_store %arg4[%c0_7, %c0_8], %12 {strides = array<i32>} : memref<8x128xf32, #tpu.memory_space<vmem>>, vector<8x128xf32>,
    return
  }
  func.func @transform_0(%arg0: i32) -> (i32, i32) {
    %c0_i32 = arith.constant 0 : i32
    %c0_i32_0 = arith.constant 0 : i32
    return %arg0, %c0_i32 : i32, i32
  }
  func.func @transform_1(%arg0: i32) -> (i32, i32) {
    %c0_i32 = arith.constant 0 : i32
    %c0_i32_0 = arith.constant 0 : i32
    %c0_i32_1 = arith.constant 0 : i32
    return %c0_i32, %c0_i32_0 : i32, i32
  }
  func.func @transform_2(%arg0: i32) -> (i32, i32) {
    %c0_i32 = arith.constant 0 : i32
    %c0_i32_0 = arith.constant 0 : i32
    %c0_i32_1 = arith.constant 0 : i32
    return %c0_i32, %c0_i32_0 : i32, i32
  }
  func.func @transform_3(%arg0: i32) -> (i32, i32) {
    %c0_i32 = arith.constant 0 : i32
    %c0_i32_0 = arith.constant 0 : i32
    return %arg0, %c0_i32 : i32, i32
  }
}

</mosaic_0001>

<bundles_post_ra>
// kernel: tpu_custom_call.1
= control target key start
LH: loop header
LB: loop body
LE: loop exit
PB: predicated region body
PF: predicated region fallthrough
CT: control target
= control target key end

     0   :  { %8 = vsyncpa [#allocation3], 0  ;;  %s389_s0 = inlined_call_operand.hbm [shape: f32[8,128], index: 0, kind: input, shape index: {}]   ;;  %s390_s1 = inlined_call_operand.hbm [shape: f32[128,128], index: 1, kind: input, shape index: {}]   ;;  %s391_s2 = inlined_call_operand.vmem [shape: f32[1,128], index: 2, kind: input, shape index: {}]   ;;  %s392_s3 = inlined_call_operand.hbm [shape: f32[8,128], index: 3, kind: output, shape index: {}]  }
   0x1   :  { %9 = vsyncpa [#allocation6], 0 }
   0x2   :  { %10 = vsyncpa [#allocation4], 0  ;;  %s315_s12 = smov [#allocation2]   ;;  %s316_s14 = smov [#allocation5]  }
   0x3   :  { %s17_s13 = sshll.u32 %s315_s12, 4  ;;  %s26_s15 = sshll.u32 %s316_s14, 4  ;;  %s18_s13 = int_to_ptr.vmem [resolvable:$true] %s17_s13  ;;  %s343_s15 = int_to_ptr.vmem [resolvable:$true] %s26_s15 }
   0x4   :  { %s243_s18 = scalar_lea.hbm %s389_s0, 128 }
   0x5   :  { %p244_p0 = scmp.ne.s32.totalorder %s389_s0, %s243_s18  ;;  %p247_p1 = scmp.lt.u32.totalorder %s243_s18, %s389_s0 }
   0x7   :  { %p249_p2 = pnand %p247_p1, %p244_p0 }
   0x9   :  { %252 = shalt.err (!%p249_p2)
}
   0xa   :  { %s253_s23 = scalar_lea.vmem %s18_s13, 128  ;;  %p258_p4 = scmp.lt.s32.totalorder %s18_s13, %s18_s13 }
   0xb   :  { %p254_p3 = scmp.ne.s32.totalorder %s18_s13, %s253_s23  ;;  %p259_p5 = scmp.lt.s32.totalorder %s253_s23, %s253_s23 }
   0xd   :  { %p260_p6 = por %p259_p5, %p258_p4 }
   0xf   :  { %p261_p7 = pnand %p260_p6, %p254_p3 }
  0x11   :  { %264 = shalt.err (!%p261_p7)
}
  0x12   :  { %20 = dma.hbm_to_vmem [thread:$0]  %s389_s0, 128, %s18_s13, [#allocation3]  }
  0x13   :  { %s265_s28 = scalar_lea.hbm %s390_s1, 2048 }
  0x14   :  { %p266_p8 = scmp.ne.s32.totalorder %s390_s1, %s265_s28  ;;  %p269_p9 = scmp.lt.u32.totalorder %s265_s28, %s390_s1 }
  0x16   :  { %p271_p10 = pnand %p269_p9, %p266_p8 }
  0x18   :  { %274 = shalt.err (!%p271_p10)
}
  0x19   :  { %s275_s6 = scalar_lea.vmem %s343_s15, 2048  ;;  %p280_p12 = scmp.lt.s32.totalorder %s343_s15, %s343_s15 }
  0x1a   :  { %p276_p11 = scmp.ne.s32.totalorder %s343_s15, %s275_s6  ;;  %p281_p13 = scmp.lt.s32.totalorder %s275_s6, %s275_s6 }
  0x1c   :  { %p282_p0 = por %p281_p13, %p280_p12 }
  0x1e   :  { %p283_p1 = pnand %p282_p0, %p276_p11 }
  0x20   :  { %286 = shalt.err (!%p283_p1)
}
  0x21   :  { %s317_s0 = smov 128   ;;  %s318_s7 = smov 8  }
  0x22   :  { %32 = dma.hbm_to_vmem [thread:$0]  %s390_s1, 2048, %s343_s15, [#allocation6], %s317_s0, %s317_s0, %s318_s7  }
  0x23   :  { %309 = dma.done.wait [#allocation3], 128  }
  0x24   :  { %310 = vsyncadd [#allocation3], 4294967168 }
  0x25   :  { %311 = dma.done.wait [#allocation6], 2048  }
  0x26   :  { %312 = vsyncadd [#allocation6], 4294965248  ;;  %v319_v0 = vmov 0.0|0.0   ;;  %vm320_vm0 = vmmov 0   ;;  %v321_v1 = vmov 0.0   ;;  %v42_v2 = vld [vmem:[#allocation5] sm:$0xff] }
  0x27   :  { %211 = vmatprep.subr.bf16.mxu0 %v319_v0  ;;  %208 = vmatprep.mubr.msk.f32.mxu0 %vm320_vm0, %v321_v1  ;;  %v43_v3 = vld [vmem:[#allocation5 + $0x8] sm:$0xff]  ;;  %v44_v5 = vld [vmem:[#allocation5 + $0x10] sm:$0xff]  ;;  %v45_v6 = vld [vmem:[#allocation5 + $0x18] sm:$0xff]  ;;  %s322_s11 = smov [#allocation7]  }
  0x28   :  { %v212_v4 = vpack.c.bf16 %v43_v3, %v42_v2  ;;  %v41_v7 = vld [vmem:[#allocation2] sm:$0xff]  ;;  %v215_v9 = vpack.c.bf16 %v45_v6, %v44_v5  ;;  %v46_v10 = vld [vmem:[#allocation5 + $0x20] sm:$0xff]  ;;  %v47_v11 = vld [vmem:[#allocation5 + $0x28] sm:$0xff]  ;;  %s148_s12 = sshll.u32 %s322_s11, 4  ;;  %s149_s12 = int_to_ptr.vmem [resolvable:$true] %s148_s12 }
  0x29   :  { %v58_v8 = vmul.f32 %v41_v7, %v41_v7  ;;  %v218_v12 = vpack.c.bf16 %v47_v11, %v46_v10  ;;  %v48_v13 = vld [vmem:[#allocation5 + $0x30] sm:$0xff]  ;;  %v49_v14 = vld [vmem:[#allocation5 + $0x38] sm:$0xff]  ;;  %v50_v16 = vld [vmem:[#allocation5 + $0x40] sm:$0xff]  ;;  %s287_s13 = scalar_lea.vmem %s149_s12, 128  ;;  %p292_p3 = scmp.lt.s32.totalorder %s149_s12, %s149_s12 }
  0x2a   :  { %213 = vmatpush3.bf16.xpose.msra.mxu0 %v212_v4  ;;  %v221_v15 = vpack.c.bf16 %v49_v14, %v48_v13  ;;  %v51_v17 = vld [vmem:[#allocation5 + $0x48] sm:$0xff]  ;;  %v52_v19 = vld [vmem:[#allocation5 + $0x50] sm:$0xff]  ;;  %v53_v20 = vld [vmem:[#allocation5 + $0x58] sm:$0xff]  ;;  %p288_p2 = scmp.ne.s32.totalorder %s149_s12, %s287_s13  ;;  %p293_p4 = scmp.lt.s32.totalorder %s287_s13, %s287_s13 }
  0x2b   :  { %214 = vmatprep.subr.bf16.mxu0 %v319_v0  ;;  %59 = vadd.xlane.f32.xlu0 %v58_v8  ;;  %v224_v18 = vpack.c.bf16 %v51_v17, %v50_v16  ;;  %v227_v21 = vpack.c.bf16 %v53_v20, %v52_v19  ;;  %v54_v22 = vld [vmem:[#allocation5 + $0x60] sm:$0xff]  ;;  %v55_v23 = vld [vmem:[#allocation5 + $0x68] sm:$0xff]  ;;  %v56_v25 = vld [vmem:[#allocation5 + $0x70] sm:$0xff] }
  0x2c   :  { %v230_v24 = vpack.c.bf16 %v55_v23, %v54_v22  ;;  %v57_v26 = vld [vmem:[#allocation5 + $0x78] sm:$0xff]  ;;  %p294_p5 = por %p293_p4, %p292_p3 }
  0x2d   :  { %v233_v27 = vpack.c.bf16 %v57_v26, %v56_v25  ;;  %v158_v29 = vld [vmem:[%s391_s2] ss:$0 sm:$0xff] }
  0x2e   :  { %p295_p6 = pnand %p294_p5, %p288_p2 }
  0x32   :  { %216 = vmatpush3.bf16.xpose.msra.mxu0 %v215_v9 }
  0x33   :  { %217 = vmatprep.subr.bf16.mxu0 %v319_v0 }
  0x3a   :  { %219 = vmatpush3.bf16.xpose.msra.mxu0 %v218_v12 }
  0x3b   :  { %220 = vmatprep.subr.bf16.mxu0 %v319_v0 }
  0x42   :  { %222 = vmatpush3.bf16.xpose.msra.mxu0 %v221_v15 }
  0x43   :  { %223 = vmatprep.subr.bf16.mxu0 %v319_v0 }
  0x4a   :  { %225 = vmatpush3.bf16.xpose.msra.mxu0 %v224_v18 }
  0x4b   :  { %226 = vmatprep.subr.bf16.mxu0 %v319_v0 }
  0x52   :  { %228 = vmatpush3.bf16.xpose.msra.mxu0 %v227_v21 }
  0x53   :  { %229 = vmatprep.subr.bf16.mxu0 %v319_v0 }
  0x5a   :  { %231 = vmatpush3.bf16.xpose.msra.mxu0 %v230_v24 }
  0x5b   :  { %232 = vmatprep.subr.bf16.mxu0 %v319_v0 }
  0x62   :  { %234 = vmatpush3.bf16.xpose.msra.mxu0 %v233_v27 }
  0x69   :  { %209 = vmatmul.mubr.f32.vlgmr.msra.gmra.mrb[0].mxu0 %v41_v7 }
  0xb8   :  { %v60_v28 = vpop.xlane.xlu0 %59 }
  0xb9   :  { %v138_v30 = vadd.f32 %v158_v29, %v60_v28 }
 0x13c   :  { %v127_v31 = vpop.f32.mrb[0].mxu0 }
 0x13d   :  { %v139_v32 = vmul.f32 2.0, %v127_v31  ;;  %v210_v33 = vpop.f32.mrb[1].mxu0 }
 0x13f   :  { %v140_v34 = vsub.f32 %v138_v30, %v139_v32 }
 0x141   :  { %141 = vst [vmem:[#allocation7] sm:$0xff] %v140_v34 }
 0x142   :  { %298 = shalt.err (!%p295_p6)
}
 0x143   :  { %s299_s2 = scalar_lea.hbm %s392_s3, 128 }
 0x144   :  { %p300_p7 = scmp.ne.s32.totalorder %s392_s3, %s299_s2  ;;  %p303_p8 = scmp.lt.u32.totalorder %s299_s2, %s392_s3 }
 0x146   :  { %p305_p9 = pnand %p303_p8, %p300_p7 }
 0x148   :  { %308 = shalt.err (!%p305_p9)
}
 0x149   :  { %151 = dma.vmem_to_hbm [thread:$0]  %s149_s12, 128, %s392_s3, [#allocation4]  }
 0x14a   :  { %313 = dma.done.wait [#allocation4], 128  }
 0x14b   :  { %314 = vsyncadd [#allocation4], 4294967168 }
 0x14c   :  { %155 = vsyncpa [#allocation3], 1 }
 0x14d   :  { %156 = vsyncpa [#allocation6], 1 }
 0x14e   :  { %157 = vsyncpa [#allocation4], 1 }

</bundles_post_ra>
